<compile_context>
chip_gen: v7x
topology: tpu7x:2x2x1
jax: 0.10.0
libtpu: 0.0.40
codegen_flags: <defaults>
</compile_context>

<pallas_src>
import functools

import jax
import jax.numpy as jnp
from jax.experimental import pallas as pl
from jax.experimental.pallas import tpu as pltpu


VMEM_LIMIT = 48 * 1024 * 1024        # explicit scoped-VMEM budget
NEG_INF = -1e30                      # large finite negative (avoids inf-inf NaN)


def _layernorm(x, g, b, eps=1e-5):
    mu = jnp.mean(x, axis=-1, keepdims=True)
    var = jnp.mean((x - mu) ** 2, axis=-1, keepdims=True)
    return (x - mu) * jax.lax.rsqrt(var + eps) * g + b


# --------------------------------------------------------------------------- #
# Kernel 1: LN1 + fused QKV projection.
#   qkv[b, t, :] = LN1(x)[b, t, :] @ W_qkv,  W_qkv = [Wq | Wk | Wv]  (E, 3E)
# grid = (B, T // tt): the MXU sees one full-width (tt,E)@(E,3E) matmul.
# --------------------------------------------------------------------------- #
def _qkv_kernel(x_ref, g_ref, b_ref, w_ref, o_ref):
    xn = _layernorm(x_ref[0], g_ref[...], b_ref[...])
    o_ref[0] = jnp.dot(xn.astype(jnp.bfloat16), w_ref[...],
                       preferred_element_type=jnp.float32).astype(jnp.bfloat16)


def qkv_proj_pallas(x, g, b, w_qkv, tt):
    B, T, E = x.shape
    E3 = w_qkv.shape[1]
    assert T % tt == 0
    flops = 2 * B * T * E * E3
    bytes_acc = 4 * B * T * E + 2 * E * E3 + 2 * B * T * E3 + 8 * E
    return pl.pallas_call(
        _qkv_kernel,
        out_shape=jax.ShapeDtypeStruct((B, T, E3), jnp.bfloat16),
        grid=(B, T // tt),
        in_specs=[
            pl.BlockSpec((1, tt, E), lambda bi, ti: (bi, ti, 0)),
            pl.BlockSpec((1, E), lambda bi, ti: (0, 0)),
            pl.BlockSpec((1, E), lambda bi, ti: (0, 0)),
            pl.BlockSpec((E, E3), lambda bi, ti: (0, 0)),
        ],
        out_specs=pl.BlockSpec((1, tt, E3), lambda bi, ti: (bi, ti, 0)),
        compiler_params=pltpu.CompilerParams(
            dimension_semantics=("parallel", "parallel"),
            vmem_limit_bytes=VMEM_LIMIT),
        cost_estimate=pl.CostEstimate(flops=flops, transcendentals=B * T,
                                      bytes_accessed=bytes_acc),
    )(x, g, b, w_qkv)


# --------------------------------------------------------------------------- #
# Kernel 2: flash-style causal multi-head attention + output projection +
#           residual add.   grid = (B, nQ, nKV), kv axis = reduction.
# The fused qkv slab is passed three times with different lane-block indices
# (0 -> Q, 1 -> K, 2 -> V), so no re-projection is ever done in this kernel.
# --------------------------------------------------------------------------- #
def _attn_kernel(x_ref, q_ref, k_ref, v_ref, wp_ref, bp_ref, o_ref,
                 m_sc, l_sc, acc_sc, *, num_heads):
    qi = pl.program_id(1)
    kvi = pl.program_id(2)
    tq = q_ref.shape[1]
    tkv = k_ref.shape[1]
    E = q_ref.shape[2]
    hs = E // num_heads
    scale = E ** -0.5                 # NB: reference scales by embed size C

    @pl.when(kvi == 0)
    def _init():
        m_sc[...] = jnp.full_like(m_sc, NEG_INF)
        l_sc[...] = jnp.zeros_like(l_sc)
        acc_sc[...] = jnp.zeros_like(acc_sc)

    # Skip KV tiles that lie entirely above the causal diagonal.
    @pl.when(kvi * tkv <= qi * tq + tq - 1)
    def _update():
        q = q_ref[0]                  # (tq, E)  bf16
        k = k_ref[0]                  # (tkv, E) bf16
        v = v_ref[0]                  # (tkv, E) bf16
        row = qi * tq + jax.lax.broadcasted_iota(jnp.int32, (tq, tkv), 0)
        col = kvi * tkv + jax.lax.broadcasted_iota(jnp.int32, (tq, tkv), 1)
        causal = row >= col
        for h in range(num_heads):    # static unroll, lane slices per head
            sl = slice(h * hs, (h + 1) * hs)
            s = jax.lax.dot_general(q[:, sl], k[:, sl],
                                    (((1,), (1,)), ((), ())),
                                    preferred_element_type=jnp.float32) * scale
            s = jnp.where(causal, s, NEG_INF)
            m_prev = m_sc[h]                                   # (tq, 1)
            m_new = jnp.maximum(m_prev, jnp.max(s, axis=-1, keepdims=True))
            alpha = jnp.exp(m_prev - m_new)
            p = jnp.exp(s - m_new)
            l_sc[h] = alpha * l_sc[h] + jnp.sum(p, axis=-1, keepdims=True)
            acc_sc[h] = alpha * acc_sc[h] + jax.lax.dot_general(
                p.astype(jnp.bfloat16), v[:, sl],
                (((1,), (0,)), ((), ())), preferred_element_type=jnp.float32)
            m_sc[h] = m_new

    @pl.when(kvi == pl.num_programs(2) - 1)
    def _finalize():
        heads = [acc_sc[h] * pl.reciprocal(l_sc[h], approx=True)
                 for h in range(num_heads)]
        attn = jnp.concatenate(heads, axis=-1)                 # (tq, E) f32
        sa = jnp.dot(attn.astype(jnp.bfloat16), wp_ref[...],
                     preferred_element_type=jnp.float32) + bp_ref[...]
        o_ref[0] = x_ref[0] + sa


def attention_pallas(x, qkv, w_proj, b_proj, num_heads, tq, tkv):
    B, T, E = x.shape
    assert T % tq == 0 and T % tkv == 0
    hs = E // num_heads
    flops = 4 * B * T * T * E + 2 * B * T * E * E
    bytes_acc = 8 * B * T * E + 6 * B * T * E + 2 * E * E + 4 * E
    kernel = functools.partial(_attn_kernel, num_heads=num_heads)
    return pl.pallas_call(
        kernel,
        out_shape=jax.ShapeDtypeStruct((B, T, E), jnp.float32),
        grid=(B, T // tq, T // tkv),
        in_specs=[
            pl.BlockSpec((1, tq, E), lambda bi, qi, ki: (bi, qi, 0)),   # residual x
            pl.BlockSpec((1, tq, E), lambda bi, qi, ki: (bi, qi, 0)),   # Q slab
            pl.BlockSpec((1, tkv, E), lambda bi, qi, ki: (bi, ki, 1)),  # K slab
            pl.BlockSpec((1, tkv, E), lambda bi, qi, ki: (bi, ki, 2)),  # V slab
            pl.BlockSpec((E, E), lambda bi, qi, ki: (0, 0)),            # W_proj
            pl.BlockSpec((1, E), lambda bi, qi, ki: (0, 0)),            # b_proj
        ],
        out_specs=pl.BlockSpec((1, tq, E), lambda bi, qi, ki: (bi, qi, 0)),
        scratch_shapes=[
            pltpu.VMEM((num_heads, tq, 1), jnp.float32),    # running max
            pltpu.VMEM((num_heads, tq, 1), jnp.float32),    # running sum
            pltpu.VMEM((num_heads, tq, hs), jnp.float32),   # output accumulator
        ],
        compiler_params=pltpu.CompilerParams(
            dimension_semantics=("parallel", "parallel", "arbitrary"),
            vmem_limit_bytes=VMEM_LIMIT),
        cost_estimate=pl.CostEstimate(flops=flops,
                                      transcendentals=B * num_heads * T * T,
                                      bytes_accessed=bytes_acc),
    )(x, qkv, qkv, qkv, w_proj, b_proj)


# --------------------------------------------------------------------------- #
# Kernel 3: (optional LN) + Linear -> ReLU -> Linear (+ optional residual),
# with the 4E hidden dim streamed as a reduction grid axis so W1/W2 arrive in
# (E, th)/(th, E) chunks and are pipelined against the matmuls.
# Used both for the per-block FFN (LN + residual) and the model's final
# LinearRELULayerNorm (no LN, no residual).
# --------------------------------------------------------------------------- #
def _ffn_kernel(x_ref, g_ref, b_ref, w1_ref, b1_ref, w2_ref, b2_ref, o_ref,
                xn_sc, acc_sc, *, use_ln, residual):
    ki = pl.program_id(2)

    @pl.when(ki == 0)
    def _init():
        x = x_ref[0]
        xn = _layernorm(x, g_ref[...], b_ref[...]) if use_ln else x
        xn_sc[...] = xn.astype(jnp.bfloat16)
        acc_sc[...] = jnp.zeros_like(acc_sc)

    h1 = jnp.maximum(
        jnp.dot(xn_sc[...], w1_ref[...], preferred_element_type=jnp.float32)
        + b1_ref[...], 0.0)
    acc_sc[...] += jnp.dot(h1.astype(jnp.bfloat16), w2_ref[...],
                           preferred_element_type=jnp.float32)

    @pl.when(ki == pl.num_programs(2) - 1)
    def _finalize():
        out = acc_sc[...] + b2_ref[...]
        if residual:
            out = out + x_ref[0]
        o_ref[0] = out


def ffn_pallas(x, g, b, w1, b1, w2, b2, *, tt, th, use_ln, residual):
    B, T, E = x.shape
    H = w1.shape[1]
    assert T % tt == 0 and H % th == 0
    flops = 4 * B * T * E * H
    bytes_acc = 8 * B * T * E + 2 * (E * H + H * E) + 4 * (H + 2 * E)
    kernel = functools.partial(_ffn_kernel, use_ln=use_ln, residual=residual)
    return pl.pallas_call(
        kernel,
        out_shape=jax.ShapeDtypeStruct((B, T, E), jnp.float32),
        grid=(B, T // tt, H // th),
        in_specs=[
            pl.BlockSpec((1, tt, E), lambda bi, ti, ki: (bi, ti, 0)),
            pl.BlockSpec((1, E), lambda bi, ti, ki: (0, 0)),
            pl.BlockSpec((1, E), lambda bi, ti, ki: (0, 0)),
            pl.BlockSpec((E, th), lambda bi, ti, ki: (0, ki)),
            pl.BlockSpec((1, th), lambda bi, ti, ki: (0, ki)),
            pl.BlockSpec((th, E), lambda bi, ti, ki: (ki, 0)),
            pl.BlockSpec((1, E), lambda bi, ti, ki: (0, 0)),
        ],
        out_specs=pl.BlockSpec((1, tt, E), lambda bi, ti, ki: (bi, ti, 0)),
        scratch_shapes=[
            pltpu.VMEM((tt, E), jnp.bfloat16),    # cached (LN'd) input tile
            pltpu.VMEM((tt, E), jnp.float32),     # accumulator over hidden chunks
        ],
        compiler_params=pltpu.CompilerParams(
            dimension_semantics=("parallel", "parallel", "arbitrary"),
            vmem_limit_bytes=VMEM_LIMIT),
        cost_estimate=pl.CostEstimate(flops=flops, transcendentals=0,
                                      bytes_accessed=bytes_acc),
    )(x, g, b, w1, b1, w2, b2)


# --------------------------------------------------------------------------- #
# Kernel 4: lm_head, tiled over the vocab dim -> lane-dense output stores and
# streamed (E, tv) weight chunks.
# --------------------------------------------------------------------------- #
def _lm_head_kernel(z_ref, w_ref, b_ref, o_ref):
    o_ref[0] = jnp.dot(z_ref[0].astype(jnp.bfloat16), w_ref[...],
                       preferred_element_type=jnp.float32) + b_ref[...]


def lm_head_pallas(z, w, bias, tv):
    B, T, E = z.shape
    V = w.shape[1]
    assert V % tv == 0
    return pl.pallas_call(
        _lm_head_kernel,
        out_shape=jax.ShapeDtypeStruct((B, T, V), jnp.float32),
        grid=(B, V // tv),
        in_specs=[
            pl.BlockSpec((1, T, E), lambda bi, vi: (bi, 0, 0)),
            pl.BlockSpec((E, tv), lambda bi, vi: (0, vi)),
            pl.BlockSpec((1, tv), lambda bi, vi: (0, vi)),
        ],
        out_specs=pl.BlockSpec((1, T, tv), lambda bi, vi: (bi, 0, vi)),
        compiler_params=pltpu.CompilerParams(
            dimension_semantics=("parallel", "parallel"),
            vmem_limit_bytes=VMEM_LIMIT),
        cost_estimate=pl.CostEstimate(
            flops=2 * B * T * E * V, transcendentals=0,
            bytes_accessed=4 * B * T * E + 2 * E * V + 4 * B * T * V + 4 * V),
    )(z, w, bias)


# --------------------------------------------------------------------------- #
# Full forward
# --------------------------------------------------------------------------- #
def transformer_lm_forward(tokens, params, num_heads, y=None):
    """Pallas equivalent of TransformerLM.forward (eval mode, dropout = identity)."""
    B, T = tokens.shape
    E = params['tok_emb'].shape[1]
    H = params['ff_w1'].shape[1]
    V = params['lm_w'].shape[1]

    # Tiles: lane dims multiples of 128, sequence tiles of 16 (bf16 packing).
    tt = 16 if T % 16 == 0 else T
    th = 256 if H % 256 == 0 else H
    tv = 128 if V % 128 == 0 else V

    # Embedding gather is glue (plain JAX): no dense Pallas hot path for gathers.
    x = params['tok_emb'][tokens] + params['pos_emb'][:T]

    for blk in params['blocks']:
        qkv = qkv_proj_pallas(x, blk['ln1_g'], blk['ln1_b'], blk['w_qkv'], tt)
        x = attention_pallas(x, qkv, blk['w_proj'], blk['b_proj'],
                             num_heads, tq=tt, tkv=tt)
        x = ffn_pallas(x, blk['ln2_g'], blk['ln2_b'], blk['w1'], blk['b1'],
                       blk['w2'], blk['b2'], tt=tt, th=th,
                       use_ln=True, residual=True)

    # Final LinearRELULayerNorm (despite its name it has no LayerNorm; the
    # model's self.ln is unused in forward()), then lm_head.
    ones = jnp.ones((1, E), jnp.float32)
    zeros = jnp.zeros((1, E), jnp.float32)
    z = ffn_pallas(x, ones, zeros, params['ff_w1'], params['ff_b1'],
                   params['ff_w2'], params['ff_b2'], tt=tt, th=th,
                   use_ln=False, residual=False)
    logits = lm_head_pallas(z, params['lm_w'], params['lm_b'], tv)

    if y is None:
        return logits, None
    # Matches PyTorch: returns logits flattened to (B*T, C) together with mean CE.
    C = logits.shape[-1]
    flat = logits.reshape(B * T, C)
    logz = jax.nn.logsumexp(flat, axis=-1)
    ll = jnp.take_along_axis(flat, y.reshape(-1, 1), axis=-1)[:, 0]
    loss = jnp.mean(logz - ll)
    return flat, loss


# TODO(synk): generate() (autoregressive multinomial sampling loop) not translated.


# --------------------------------------------------------------------------- #
# Deterministic parameter init (shapes follow TransformerLM.__init__;
# large matmul weights stored in bf16, LN params / biases / embeddings in f32)
# --------------------------------------------------------------------------- #
def init_params(key, vocab, ctx, E, hs, num_blocks):
    bf = jnp.bfloat16

    def nrm(k, shape, dtype=jnp.float32, scale=0.05):
        return (scale * jax.random.normal(k, shape)).astype(dtype)

    keys = iter(jax.random.split(key, 8 + num_blocks * 8))
    p = {
        'tok_emb': nrm(next(keys), (vocab, E)),
        'pos_emb': nrm(next(keys), (ctx, E)),
        'ff_w1': nrm(next(keys), (E, 4 * E), bf),
        'ff_b1': nrm(next(keys), (1, 4 * E)),
        'ff_w2': nrm(next(keys), (4 * E, E), bf),
        'ff_b2': nrm(next(keys), (1, E)),
        'lm_w': nrm(next(keys), (E, vocab), bf),
        'lm_b': nrm(next(keys), (1, vocab)),
        'blocks': [],
    }
    for _ in range(num_blocks):
        blk = {
            'ln1_g': jnp.ones((1, E), jnp.float32),
            'ln1_b': jnp.zeros((1, E), jnp.float32),
            'w_qkv': nrm(next(keys), (E, 3 * E), bf),   # [Wq | Wk | Wv], head cols
            'w_proj': nrm(next(keys), (E, E), bf),
            'b_proj': nrm(next(keys), (1, E)),
            'ln2_g': jnp.ones((1, E), jnp.float32),
            'ln2_b': jnp.zeros((1, E), jnp.float32),
            'w1': nrm(next(keys), (E, 4 * E), bf),
            'b1': nrm(next(keys), (1, 4 * E)),
            'w2': nrm(next(keys), (4 * E, E), bf),
            'b2': nrm(next(keys), (1, E)),
        }
        p['blocks'].append(blk)
    return p


# --------------------------------------------------------------------------- #
# Pure-JAX reference (mirrors the PyTorch forward; same bf16-matmul precision)
# --------------------------------------------------------------------------- #
def reference_forward(tokens, params, num_heads):
    bf = jnp.bfloat16

    def mm(a, b):
        return jnp.matmul(a.astype(bf), b.astype(bf),
                          preferred_element_type=jnp.float32)

    def ln(x, g, b):
        mu = x.mean(-1, keepdims=True)
        var = ((x - mu) ** 2).mean(-1, keepdims=True)
        return (x - mu) / jnp.sqrt(var + 1e-5) * g + b

    B, T = tokens.shape
    x = params['tok_emb'][tokens] + params['pos_emb'][:T]
    E = x.shape[-1]
    hs = E // num_heads
    mask0 = jnp.tril(jnp.ones((T, T))) == 0
    for blk in params['blocks']:
        xn = ln(x, blk['ln1_g'], blk['ln1_b'])
        qkv = mm(xn, blk['w_qkv']).astype(bf)              # (B, T, 3E)
        q, k, v = qkv[..., :E], qkv[..., E:2 * E], qkv[..., 2 * E:]
        heads = []
        for h in range(num_heads):
            sl = slice(h * hs, (h + 1) * hs)
            w = mm(q[..., sl], jnp.swapaxes(k[..., sl], -2, -1)) * E ** (-0.5)
            w = jnp.where(mask0, -jnp.inf, w)
            w = jax.nn.softmax(w, axis=-1)
            heads.append(mm(w, v[..., sl]))
        cat = jnp.concatenate(heads, axis=-1)
        x = x + mm(cat, blk['w_proj']) + blk['b_proj']
        xn2 = ln(x, blk['ln2_g'], blk['ln2_b'])
        x = x + mm(jnp.maximum(mm(xn2, blk['w1']) + blk['b1'], 0.0),
                   blk['w2']) + blk['b2']
    z = mm(jnp.maximum(mm(x, params['ff_w1']) + params['ff_b1'], 0.0),
           params['ff_w2']) + params['ff_b2']
    return mm(z, params['lm_w']) + params['lm_b']


# --------------------------------------------------------------------------- #
if __name__ == "__main__":
    vocab_size, context_size, embed_size, head_size, num_blocks = 256, 32, 128, 32, 2
    num_heads = embed_size // head_size            # = 4 (as in TransformerLM.__init__)
    B, T = 2, 32

    params = init_params(jax.random.PRNGKey(0), vocab_size, context_size,
                         embed_size, head_size, num_blocks)
    tokens = jax.random.randint(jax.random.PRNGKey(1), (B, T), 0, vocab_size,
                                dtype=jnp.int32)

    logits, loss = transformer_lm_forward(tokens, params, num_heads)
    logits = jax.block_until_ready(logits)
    assert logits.shape == (B, T, vocab_size) and loss is None

    ref = reference_forward(tokens, params, num_heads)
    err = float(jnp.max(jnp.abs(logits - ref)))
    assert err < 2e-2, f"max abs err {err}"

    # Exercise the loss path (matches PyTorch: flattened logits + mean CE).
    y = jax.random.randint(jax.random.PRNGKey(2), (B, T), 0, vocab_size,
                           dtype=jnp.int32)
    flat_logits, loss = transformer_lm_forward(tokens, params, num_heads, y)
    loss = jax.block_until_ready(loss)
    assert flat_logits.shape == (B * T, vocab_size) and bool(jnp.isfinite(loss))

    print("KERNEL_OK")
</pallas_src>

<mosaic_0001>
module attributes {stable_mosaic.version = 11 : i64} {
  func.func @_qkv_kernel(%arg0: i32, %arg1: i32, %arg2: memref<1x16x128xf32, #tpu.memory_space<vmem>>, %arg3: memref<1x128xf32, #tpu.memory_space<vmem>>, %arg4: memref<1x128xf32, #tpu.memory_space<vmem>>, %arg5: memref<128x384xbf16, #tpu.memory_space<vmem>>, %arg6: memref<1x16x384xbf16, #tpu.memory_space<vmem>>) attributes {dimension_semantics = [#tpu.dimension_semantics<parallel>, #tpu.dimension_semantics<parallel>], iteration_bounds = array<i64: 2, 2>, scalar_prefetch = 0 : i64, scratch_operands = 0 : i64, tpu.core_type = #tpu.core_type<tc>, window_params = [{transform_indices = @transform_0, window_bounds = array<i64: 1, 16, 128>}, {pipeline_mode = #tpu.pipeline_mode<synchronous>, transform_indices = @transform_1, window_bounds = array<i64: 1, 128>}, {pipeline_mode = #tpu.pipeline_mode<synchronous>, transform_indices = @transform_2, window_bounds = array<i64: 1, 128>}, {pipeline_mode = #tpu.pipeline_mode<synchronous>, transform_indices = @transform_3, window_bounds = array<i64: 128, 384>}, {transform_indices = @transform_4, window_bounds = array<i64: 1, 16, 384>}]} {
    %c0 = arith.constant 0 : index
    %c0_0 = arith.constant 0 : index
    %c0_1 = arith.constant 0 : index
    %0 = vector.load %arg2[%c0, %c0_0, %c0_1] : memref<1x16x128xf32, #tpu.memory_space<vmem>>, vector<1x16x128xf32>
    %1 = vector.shape_cast %0 : vector<1x16x128xf32> to vector<16x128xf32>
    %c0_2 = arith.constant 0 : index
    %c0_3 = arith.constant 0 : index
    %2 = vector.load %arg3[%c0_2, %c0_3] : memref<1x128xf32, #tpu.memory_space<vmem>>, vector<1x128xf32>
    %c0_4 = arith.constant 0 : index
    %c0_5 = arith.constant 0 : index
    %3 = vector.load %arg4[%c0_4, %c0_5] : memref<1x128xf32, #tpu.memory_space<vmem>>, vector<1x128xf32>
    %cst = arith.constant dense<0.000000e+00> : vector<16xf32>
    %4 = vector.multi_reduction <add>, %1, %cst [1] : vector<16x128xf32> to vector<16xf32>
    %5 = vector.shape_cast %4 : vector<16xf32> to vector<16x1xf32>
    %cst_6 = arith.constant 1.280000e+02 : f32
    %6 = vector.broadcast %cst_6 : f32 to vector<16x1xf32>
    %7 = arith.divf %5, %6 : vector<16x1xf32>
    %8 = vector.broadcast %7 : vector<16x1xf32> to vector<16x128xf32>
    %9 = arith.subf %1, %8 : vector<16x128xf32>
    %10 = arith.mulf %9, %9 : vector<16x128xf32>
    %cst_7 = arith.constant dense<0.000000e+00> : vector<16xf32>
    %11 = vector.multi_reduction <add>, %10, %cst_7 [1] : vector<16x128xf32> to vector<16xf32>
    %12 = vector.shape_cast %11 : vector<16xf32> to vector<16x1xf32>
    %cst_8 = arith.constant 1.280000e+02 : f32
    %13 = vector.broadcast %cst_8 : f32 to vector<16x1xf32>
    %14 = arith.divf %12, %13 : vector<16x1xf32>
    %15 = vector.broadcast %7 : vector<16x1xf32> to vector<16x128xf32>
    %16 = arith.subf %1, %15 : vector<16x128xf32>
    %cst_9 = arith.constant 9.99999974E-6 : f32
    %17 = vector.broadcast %cst_9 : f32 to vector<16x1xf32>
    %18 = arith.addf %14, %17 : vector<16x1xf32>
    %19 = math.rsqrt %18 : vector<16x1xf32>
    %20 = vector.broadcast %19 : vector<16x1xf32> to vector<16x128xf32>
    %21 = arith.mulf %16, %20 : vector<16x128xf32>
    %22 = vector.broadcast %2 : vector<1x128xf32> to vector<16x128xf32>
    %23 = arith.mulf %21, %22 : vector<16x128xf32>
    %24 = vector.broadcast %3 : vector<1x128xf32> to vector<16x128xf32>
    %25 = arith.addf %23, %24 : vector<16x128xf32>
    %26 = arith.truncf %25 : vector<16x128xf32> to vector<16x128xbf16>
    %c0_10 = arith.constant 0 : index
    %c0_11 = arith.constant 0 : index
    %27 = vector.load %arg5[%c0_10, %c0_11] : memref<128x384xbf16, #tpu.memory_space<vmem>>, vector<128x384xbf16>
    %cst_12 = arith.constant dense<0.000000e+00> : vector<16x384xf32>
    %28 = tpu.matmul %26, %27, %cst_12 {dimension_numbers = #tpu.dot_dimension_numbers<[1], [0], [0], [1], [0, 0, 1, 1], [], []>} : vector<16x128xbf16>, vector<128x384xbf16>, vector<16x384xf32> -> vector<16x384xf32>
    %29 = arith.truncf %28 : vector<16x384xf32> to vector<16x384xbf16>
    %c0_13 = arith.constant 0 : index
    %c0_14 = arith.constant 0 : index
    %c0_15 = arith.constant 0 : index
    %30 = vector.load %arg6[%c0_13, %c0_14, %c0_15] : memref<1x16x384xbf16, #tpu.memory_space<vmem>>, vector<1x16x384xbf16>
    %31 = vector.shape_cast %30 : vector<1x16x384xbf16> to vector<16x384xbf16>
    %32 = vector.shape_cast %29 : vector<16x384xbf16> to vector<1x16x384xbf16>
    tpu.vector_store %arg6[%c0_13, %c0_14, %c0_15], %32 {strides = array<i32>} : memref<1x16x384xbf16, #tpu.memory_space<vmem>>, vector<1x16x384xbf16>,
    return
  }
  func.func @transform_0(%arg0: i32, %arg1: i32) -> (i32, i32, i32) {
    %c0_i32 = arith.constant 0 : i32
    %c0_i32_0 = arith.constant 0 : i32
    return %arg0, %arg1, %c0_i32 : i32, i32, i32
  }
  func.func @transform_1(%arg0: i32, %arg1: i32) -> (i32, i32) {
    %c0_i32 = arith.constant 0 : i32
    %c0_i32_0 = arith.constant 0 : i32
    %c0_i32_1 = arith.constant 0 : i32
    return %c0_i32, %c0_i32_0 : i32, i32
  }
  func.func @transform_2(%arg0: i32, %arg1: i32) -> (i32, i32) {
    %c0_i32 = arith.constant 0 : i32
    %c0_i32_0 = arith.constant 0 : i32
    %c0_i32_1 = arith.constant 0 : i32
    return %c0_i32, %c0_i32_0 : i32, i32
  }
  func.func @transform_3(%arg0: i32, %arg1: i32) -> (i32, i32) {
    %c0_i32 = arith.constant 0 : i32
    %c0_i32_0 = arith.constant 0 : i32
    %c0_i32_1 = arith.constant 0 : i32
    return %c0_i32, %c0_i32_0 : i32, i32
  }
  func.func @transform_4(%arg0: i32, %arg1: i32) -> (i32, i32, i32) {
    %c0_i32 = arith.constant 0 : i32
    %c0_i32_0 = arith.constant 0 : i32
    return %arg0, %arg1, %c0_i32 : i32, i32, i32
  }
}

</mosaic_0001>

<bundles_post_ra>
// kernel: tpu_custom_call.1
= control target key start
LH: loop header
LB: loop body
LE: loop exit
PB: predicated region body
PF: predicated region fallthrough
CT: control target
= control target key end

     0   :  { %s1366_s0 = inlined_call_operand.hbm [shape: f32[2,32,128], index: 0, kind: input, shape index: {}]   ;;  %s1367_s1 = inlined_call_operand.vmem [shape: f32[1,128], index: 1, kind: input, shape index: {}]   ;;  %s1368_s2 = inlined_call_operand.vmem [shape: f32[1,128], index: 2, kind: input, shape index: {}]   ;;  %s1369_s3 = inlined_call_operand.hbm [shape: bf16[128,384], index: 3, kind: input, shape index: {}]   ;;  %s1370_s4 = inlined_call_operand.hbm [shape: bf16[2,32,384], index: 4, kind: output, shape index: {}]  }
   0x1   :  { %1380 = sst [smem:[#allocation16_spill]] %s1369_s3 }
   0x2   :  { %9 = vsyncpa [#allocation3], 0 }
   0x3   :  { %11 = vsyncpa [#allocation3 + $0x1], 0 }
   0x4   :  { %12 = vsyncpa [#allocation6], 0 }
   0x5   :  { %13 = vsyncpa [#allocation4], 0 }
   0x6   :  { %15 = vsyncpa [#allocation4 + $0x1], 0  ;;  %s1097_s15 = smov 0   ;;  %s1099_s16 = smov 0  }
   0x7   :  { %s1101_s17 = smov 0   ;;  %s1103_s18 = smov 0  }
   0x8   :  { %s1105_s19 = smov 0   ;;  %s1107_s20 = smov 0  }
   0x9   :  { %s1109_s21 = smov 0   ;;  %s1111_s22 = smov 0  }
   0xa LB: > { %1381 = sst [smem:[#allocation11_spill]] %s1030_s15  ;;  %s681_s23 = sadd.s32 4294967295, %s1058_s22   ;;  %s1058_s22 = sphi %s1111_s22, %s21_s22   ;;  %s1054_s21 = sphi %s1109_s21, %s1410_s21   ;;  %s1050_s20 = sphi %s1107_s20, %s1404_s20   ;;  %s1046_s19 = sphi %s1105_s19, %s1409_s19   ;;  %s1042_s18 = sphi %s1103_s18, %s1403_s18   ;;  %s1038_s17 = sphi %s1101_s17, %s1408_s17   ;;  %s1034_s16 = sphi %s1099_s16, %s1407_s16   ;;  %s1030_s15 = sphi %s1097_s15, %s1406_s15  }
   0xb   : > { %1382 = sst [smem:[#allocation12_spill]] %s1050_s20  ;;  %s682_s24 = sadd.s32 4294967294, %s1058_s22  }
   0xc   : > { %p55_p0 = scmp.ne.s32.totalorder %s1034_s16, %s1030_s15  ;;  %p1141_p1 = scmp.eq.s32.totalorder %s681_s23, 0 }
   0xd   : > { %p1145_p2 = scmp.eq.s32.totalorder %s681_s23, 3  ;;  %p150_p3 = scmp.eq.s32.totalorder %s682_s24, 3 }
   0xe   : > { %s1383_s25 = scalar_select %p1141_p1, 1, 0 }
   0xf   : > { %s1384_s26 = scalar_select %p1145_p2, 1, 0 }
  0x10   : > { %p1151_p4 = por %p1141_p1, %p55_p0  ;;  %p683_p5 = scmp.ge.s32.totalorder %s1058_s22, 1 }
  0x11   : > { %p1156_p6 = por %p150_p3, %p55_p0  ;;  %p157_p7 = scmp.lt.s32.totalorder %s1058_s22, 5 }
  0x12   : > { %s1385_s27 = scalar_select %p1151_p4, 1, 0 }
  0x13   : > { %s1386_s28 = scalar_select %p1156_p6, 1, 0 }
  0x14   : > { %p1161_p8 = pnand %p683_p5, %p157_p7  ;;  %s1060_s30 = smov [#allocation5]  }
  0x15   : > { %1387 = sst [smem:[#allocation13_spill]] %s1386_s28  ;;  %s175_s5 = sshll.u32 %s1060_s30, 4  ;;  %s176_s5 = int_to_ptr.vmem [resolvable:$true] %s175_s5 }
  0x16   : > { %s1388_s29 = scalar_select %p1161_p8, 1, 0 }
  0x17   : > { %p772_p9 = pneg %p1161_p8  ;;  %s1390_s3 = sld [smem:[#allocation16_spill]] }
  0x19   : > { %p1169_p10 = pnand %p772_p9, %p1141_p1 }
  0x1b   : > { %p900_p12 = pneg %p1169_p10 }
  0x1d   : > { %s898_s9 = scalar_lea.hbm %s1390_s3, 3072 }
  0x1e   : > { %p899_p11 = scmp.ne.s32.totalorder %s1390_s3, %s898_s9  ;;  %p905_p3 = scmp.lt.u32.totalorder %s898_s9, %s1390_s3 }
  0x20   : > { %p901_p13 = pnand %p900_p12, %p899_p11 }
  0x22   : > { %p902_p0 = pneg %p901_p13 }
  0x24   : > { %p907_p5 = pnand %p905_p3, %p902_p0 }
  0x26   : > { %910 = shalt.err (!%p907_p5)
}
  0x27   : > { %s911_s14 = scalar_lea.vmem %s176_s5, 3072  ;;  %p919_p1 = scmp.lt.s32.totalorder %s176_s5, %s176_s5 }
  0x28   : > { %p912_p7 = scmp.ne.s32.totalorder %s176_s5, %s911_s14  ;;  %p920_p4 = scmp.lt.s32.totalorder %s911_s14, %s911_s14 }
  0x2a   : > { %p914_p9 = pnand %p912_p7, %p900_p12  ;;  %p921_p8 = por %p920_p4, %p919_p1 }
  0x2c   : > { %p915_p6 = pneg %p914_p9 }
  0x2e   : > { %p922_p2 = pnand %p921_p8, %p915_p6 }
  0x30   : > { %925 = shalt.err (!%p922_p2)
}
  0x31   : > { %s1061_s23 = smov 192   ;;  %s1062_s24 = smov 12  }
  0x32   : > { %775 = dma.hbm_to_vmem [thread:$0]  (!%p1169_p10), %s1390_s3, 3072, %s176_s5, [#allocation6], %s1061_s23, %s1061_s23, %s1062_s24  }
  0x33   : > { %s30_s8 = sadd.s32 1, %s1050_s20  ;;  %s33_s9 = sadd.s32 1, %s1054_s21 }
  0x34   : > { %p31_p1 = scmp.ge.s32.totalorder %s30_s8, 2  ;;  %s42_s10 = sadd.s32 1, %s1038_s17 }
  0x35   : > { %p49_p2 = scmp.ne.s32.totalorder %s1038_s17, %s1034_s16  ;;  %p50_p4 = scmp.eq.s32.totalorder %s1058_s22, 0 }
  0x36   : > { %s1412_s8 = smov (%p31_p1, %s30_s8), 0  ;;  %s1414_s9 = smov (!%p31_p1, %s33_s9), %s1054_s21 }
  0x37   : > { %1391 = sst [smem:[#allocation14_spill]] %s1412_s8  ;;  %s38_s11 = ssub.s32 %s1050_s20, %s1412_s8 }
  0x38   : > { %p35_p6 = scmp.ge.s32.totalorder %s1414_s9, 2  ;;  %p1392_p8 = scmp.ne.s32.totalorder %s1384_s26, 0 }
  0x39   : > { %p1206_p10 = por %p50_p4, %p49_p2  ;;  %p785_p12 = scmp.lt.s32.totalorder %s1058_s22, 4 }
  0x3a   : > { %p1202_p11 = por %p1392_p8, %p49_p2  ;;  %s1416_s9 = smov (%p35_p6, %s1414_s9), 0 }
  0x3b   : > { %1395 = sst [smem:[#allocation15_spill]] %s1416_s9  ;;  %s189_s12 = sand.u32 1, %s1038_s17  }
  0x3c   : > { %s687_s13 = sshll.u32 %s1050_s20, 1  ;;  %s37_s14 = ssub.s32 %s1054_s21, %s1416_s9 }
  0x3d   : > { %s39_s23 = sor.u32 %s38_s11, %s37_s14  ;;  %s686_s24 = sshll.u32 %s189_s12, 4 }
  0x3e   : > { %p40_p13 = scmp.eq.s32.totalorder %s39_s23, 0  ;;  %s688_s26 = sshll.u32 %s1054_s21, 2 }
  0x3f   : > { %s193_s30 = scalar_lea.vmem [#allocation2], %s686_s24  ;;  %s199_s8 = sadd.s32 %s688_s26, %s687_s13 }
  0x40   : > { %s202_s7 = sshll.u32 %s193_s30, 4  ;;  %s689_s28 = sshll.u32 %s199_s8, 7  ;;  %s1221_s7 = int_to_ptr.vmem [resolvable:$true] %s202_s7 }
  0x41   : > { %s1219_s3 = scalar_select %p40_p13, %s1038_s17, %s42_s10  }
  0x42   : > { %p1227_p0 = pnand %p785_p12, %p1206_p10  ;;  %s1234_s11 = scalar_lea.hbm %s1366_s0, %s689_s28 }
  0x43   : > { %s1236_s10 = scalar_lea.sflag [#allocation3], %s189_s12  ;;  %s926_s8 = scalar_lea.hbm %s1234_s11, 256 }
  0x44   : > { %p927_p3 = scmp.ne.s32.totalorder %s1234_s11, %s926_s8  ;;  %p928_p5 = pneg %p1227_p0 }
  0x45   : > { %s931_s9 = scalar_lea.hbm %s1366_s0, 1024  ;;  %p932_p1 = scmp.lt.u32.totalorder %s1234_s11, %s1366_s0 }
  0x46   : > { %p929_p7 = pnand %p928_p5, %p927_p3  ;;  %p933_p2 = scmp.lt.u32.totalorder %s931_s9, %s926_s8 }
  0x47   : > { %p935_p6 = scmp.lt.u32.totalorder %s926_s8, %s1234_s11 }
  0x48   : > { %p930_p9 = pneg %p929_p7  ;;  %p934_p4 = por %p933_p2, %p932_p1 }
  0x4a   : > { %p936_p8 = por %p935_p6, %p934_p4 }
  0x4c   : > { %p937_p10 = pnand %p936_p8, %p930_p9 }
  0x4e   : > { %940 = shalt.err (!%p937_p10)
}
  0x4f   : > { %s941_s12 = scalar_lea.vmem %s1221_s7, 256  ;;  %s1063_s14 = smov [#allocation2]  }
  0x50   : > { %p942_p12 = scmp.ne.s32.totalorder %s1221_s7, %s941_s12  ;;  %s946_s23 = sshll.u32 %s1063_s14, 4  ;;  %s947_s23 = int_to_ptr.vmem [resolvable:$false] %s946_s23 }
  0x51   : > { %s948_s24 = scalar_lea.vmem %s947_s23, 512  ;;  %p949_p7 = scmp.lt.s32.totalorder %s1221_s7, %s947_s23 }
  0x52   : > { %p944_p13 = pnand %p942_p12, %p928_p5  ;;  %p950_p1 = scmp.lt.s32.totalorder %s948_s24, %s941_s12 }
  0x54   : > { %p945_p3 = pneg %p944_p13  ;;  %p951_p2 = por %p950_p1, %p949_p7 }
  0x56   : > { %p952_p4 = pnand %p951_p2, %p945_p3 }
  0x58   : > { %955 = shalt.err (!%p952_p4)
}
  0x59   : > { %s1064_s26 = smov 128   ;;  %s1065_s30 = smov 8  }
  0x5a   : > { %779 = dma.hbm_to_vmem [thread:$0]  (!%p1227_p0), %s1234_s11, 256, %s1221_s7, %s1236_s10, %s1064_s26, %s1064_s26, %s1065_s30  }
  0x5b   : > { %p1397_p5 = scmp.ne.s32.totalorder %s1388_s29, 0 }
  0x5c   : > { %s1267_s8 = sand.u32 (!%p1397_p5), 1, %s1034_s16   ;;  %p1398_p9 = scmp.ne.s32.totalorder (!%p1397_p5), %s1385_s27, 0 }
  0x5d   : > { %214 = sbr.rel (%p1397_p5) target bundleno = 654 (0x28e), region = 36  ;;  %s691_s5 = sshll.u32 (!%p1397_p5), %s1267_s8, 4 }
  0x5e   : > { %s217_s20 = scalar_lea.sflag (!%p1397_p5), [#allocation3], %s1267_s8  ;;  %s220_s9 = scalar_lea.vmem (!%p1397_p5), [#allocation2], %s691_s5 }
  0x64   : > { %1017 = dma.done.wait (%p1398_p9), %s217_s20, 256  }
  0x65   : > { %1019 = vsyncadd (%p1398_p9), %s217_s20, 4294967040  ;;  %p1399_p6 = scmp.ne.s32.totalorder %s1383_s25, 0 }
  0x67   : > { %1021 = dma.done.wait (%p1399_p6), [#allocation6], 3072  }
  0x68   : > { %1023 = vsyncadd (%p1399_p6), [#allocation6], 4294964224  ;;  %v252_v0 = vld [vmem:[%s220_s9] sm:$0xff]  ;;  %v253_v1 = vld [vmem:[%s220_s9 + $0x8] sm:$0xff]  ;;  %v1066_v4 = vmov 0.0   ;;  %v1067_v30 = vmov 0  }
  0x69   : > { %256 = vadd.xlane.f32.xlu0 %v252_v0  ;;  %v862_v2 = vld [vmem:[#allocation5 + $0x4] ss:$12 sps:$4 sm:$0xff]   ;;  %v864_v3 = vld [vmem:[#allocation5] ss:$12 sps:$4 sm:$0xff]   ;;  %741 = vmatprep.subr.bf16.mxu1 %v1066_v4  ;;  %v865_v5 = vld [vmem:[#allocation5 + $0x8] ss:$12 sps:$4 sm:$0xff]  }
  0x6a   : > { %v866_v6 = vld [vmem:[#allocation5 + $0x1c] ss:$12 sps:$4 sm:$0xff]   ;;  %456 = vmatprep.subr.bf16.mxu0 %v862_v2  ;;  %742 = vmatpush3.bf16.msra.mxu1 %v865_v5  ;;  %v868_v15 = vld [vmem:[#allocation5 + $0x18] ss:$12 sps:$4 sm:$0xff]   ;;  %v869_v16 = vld [vmem:[#allocation5 + $0x20] ss:$12 sps:$4 sm:$0xff]  }
  0x6b   : > { %457 = vmatpush1.bf16.msra.mxu0 %v864_v3  ;;  %743 = vmatprep.subr.bf16.mxu1 %v1066_v4  ;;  %v870_v17 = vld [vmem:[#allocation5 + $0x34] ss:$12 sps:$4 sm:$0xff]   ;;  %v872_v18 = vld [vmem:[#allocation5 + $0x30] ss:$12 sps:$4 sm:$0xff]   ;;  %v873_v19 = vld [vmem:[#allocation5 + $0x38] ss:$12 sps:$4 sm:$0xff]  }
  0x6c   : > { %458 = vmatprep.subr.bf16.mxu0 %v866_v6  ;;  %v874_v20 = vld [vmem:[#allocation5 + $0x4c] ss:$12 sps:$4 sm:$0xff]   ;;  %v876_v21 = vld [vmem:[#allocation5 + $0x48] ss:$12 sps:$4 sm:$0xff]   ;;  %v877_v22 = vld [vmem:[#allocation5 + $0x50] ss:$12 sps:$4 sm:$0xff]   ;;  %488 = vmatprep.mubr.bf16.mxu0 %v1067_v30 }
  0x6d   : > { %258 = vadd.xlane.f32.xlu0 %v253_v1  ;;  %v878_v23 = vld [vmem:[#allocation5 + $0x64] ss:$12 sps:$4 sm:$0xff]   ;;  %v880_v24 = vld [vmem:[#allocation5 + $0x60] ss:$12 sps:$4 sm:$0xff]   ;;  %v881_v25 = vld [vmem:[#allocation5 + $0x68] ss:$12 sps:$4 sm:$0xff]  }
  0x6e   : > { %744 = vmatpush3.bf16.msra.mxu1 %v869_v16  ;;  %v882_v26 = vld [vmem:[#allocation5 + $0x7c] ss:$12 sps:$4 sm:$0xff]   ;;  %v884_v27 = vld [vmem:[#allocation5 + $0x78] ss:$12 sps:$4 sm:$0xff]   ;;  %v885_v28 = vld [vmem:[#allocation5 + $0x80] ss:$12 sps:$4 sm:$0xff]  }
  0x6f   : > { %459 = vmatpush1.bf16.msra.mxu0 %v868_v15  ;;  %745 = vmatprep.subr.bf16.mxu1 %v1066_v4  ;;  %v886_v29 = vld [vmem:[#allocation5 + $0x94] ss:$12 sps:$4 sm:$0xff]   ;;  %vm1068_vm0 = vmmov 0   ;;  %v888_v31 = vld [vmem:[#allocation5 + $0x90] ss:$12 sps:$4 sm:$0xff]   ;;  %s762_s7 = smul.u32 6, %s1042_s18 }
  0x70   : > { %460 = vmatprep.subr.bf16.mxu0 %v870_v17  ;;  %757 = vmatprep.mubr.msk.bf16.mxu1 %vm1068_vm0, %v1066_v4  ;;  %v889_v32 = vld [vmem:[#allocation5 + $0x98] ss:$12 sps:$4 sm:$0xff]   ;;  %v892_v34 = vld [vmem:[#allocation5 + $0xa8] ss:$12 sps:$4 sm:$0xff]   ;;  %v893_v35 = vld [vmem:[#allocation5 + $0xb0] ss:$12 sps:$4 sm:$0xff]  }
  0x71   : > { %v890_v33 = vld [vmem:[#allocation5 + $0xac] ss:$12 sps:$4 sm:$0xff]   ;;  %v693_v44 = vld [vmem:[%s1367_s1] ss:$0 sm:$0xff]  ;;  %s763_s11 = smul.u32 12, %s1046_s19  ;;  %s565_s24 = scalar_lea.sflag [#allocation4], %s1267_s8 }
  0x72   : > { %746 = vmatpush3.bf16.msra.mxu1 %v873_v19  ;;  %v694_v48 = vld [vmem:[%s1368_s2] ss:$0 sm:$0xff]  ;;  %s761_s10 = smul.u32 24, %s1267_s8  ;;  %s1069_s30 = smov [#allocation7]  }
  0x73   : > { %461 = vmatpush1.bf16.msra.mxu0 %v872_v18  ;;  %747 = vmatprep.subr.bf16.mxu1 %v1066_v4  ;;  %s578_s28 = sadd.s32 %s763_s11, %s762_s7  ;;  %s960_s5 = sshll.u32 %s1069_s30, 4  ;;  %s961_s5 = int_to_ptr.vmem [resolvable:$false] %s960_s5 }
  0x74   : > { %462 = vmatprep.subr.bf16.mxu0 %v874_v20  ;;  %s248_s13 = scalar_lea.vmem [#allocation7], %s761_s10  ;;  %s725_s14 = sshll.u32 %s578_s28, 6 }
  0x75   : > { %s581_s12 = sshll.u32 %s248_s13, 4  ;;  %s1312_s23 = scalar_lea.hbm %s1370_s4, %s725_s14  ;;  %s1307_s12 = int_to_ptr.vmem [resolvable:$true] %s581_s12 }
  0x76   : > { %748 = vmatpush3.bf16.msra.mxu1 %v877_v22  ;;  %s956_s26 = scalar_lea.vmem %s1307_s12, 384  ;;  %s962_s20 = scalar_lea.vmem %s961_s5, 768 }
  0x77   : > { %463 = vmatpush1.bf16.msra.mxu0 %v876_v21  ;;  %749 = vmatprep.subr.bf16.mxu1 %v1066_v4  ;;  %p957_p0 = scmp.ne.s32.totalorder %s1307_s12, %s956_s26  ;;  %p963_p12 = scmp.lt.s32.totalorder %s1307_s12, %s961_s5 }
  0x78   : > { %464 = vmatprep.subr.bf16.mxu0 %v878_v23  ;;  %p964_p13 = scmp.lt.s32.totalorder %s962_s20, %s956_s26 }
  0x79   : > { %p958_p8 = pnand %p957_p0, %p1202_p11 }
  0x7a   : > { %750 = vmatpush3.bf16.msra.mxu1 %v881_v25  ;;  %p965_p3 = por %p964_p13, %p963_p12 }
  0x7b   : > { %465 = vmatpush1.bf16.msra.mxu0 %v880_v24  ;;  %751 = vmatprep.subr.bf16.mxu1 %v1066_v4  ;;  %p959_p10 = pneg %p958_p8 }
  0x7c   : > { %466 = vmatprep.subr.bf16.mxu0 %v882_v26 }
  0x7d   : > { %p966_p7 = pnand %p965_p3, %p959_p10 }
  0x7e   : > { %752 = vmatpush3.bf16.msra.mxu1 %v885_v28 }
  0x7f   : > { %467 = vmatpush1.bf16.msra.mxu0 %v884_v27  ;;  %753 = vmatprep.subr.bf16.mxu1 %v1066_v4 }
  0x80   : > { %468 = vmatprep.subr.bf16.mxu0 %v886_v29 }
  0x82   : > { %754 = vmatpush3.bf16.msra.mxu1 %v889_v32 }
  0x83   : > { %469 = vmatpush1.bf16.msra.mxu0 %v888_v31  ;;  %755 = vmatprep.subr.bf16.mxu1 %v1066_v4 }
  0x84   : > { %470 = vmatprep.subr.bf16.mxu0 %v890_v33 }
  0x86   : > { %756 = vmatpush3.bf16.msra.mxu1 %v893_v35 }
  0x87   : > { %471 = vmatpush1.bf16.msra.mxu0 %v892_v34 }
  0xf6   : > { %v257_v7 = vpop.xlane.xlu0 %256 }
  0xf7   : > { %v261_v8 = vmul.f32 0.0078125, %v257_v7 }
  0xf9   : > { %v1281_v9 = vsub.f32 %v252_v0, %v261_v8 }
  0xfa   : > { %v259_v10 = vpop.xlane.xlu0 %258 }
  0xfb   : > { %v262_v11 = vmul.f32 0.0078125, %v259_v10  ;;  %v265_v12 = vmul.f32 %v1281_v9, %v1281_v9 }
  0xfd   : > { %v1285_v13 = vsub.f32 %v253_v1, %v262_v11  ;;  %267 = vadd.xlane.f32.xlu1 %v265_v12 }
  0xff   : > { %v266_v14 = vmul.f32 %v1285_v13, %v1285_v13 }
 0x101   : > { %269 = vadd.xlane.f32.xlu1 %v266_v14 }
 0x18a   : > { %v268_v36 = vpop.xlane.xlu1 %267 }
 0x18b   : > { %v271_v37 = vmul.f32 0.0078125, %v268_v36 }
 0x18d   : > { %v273_v38 = vadd.f32 1e-05, %v271_v37 }
 0x18e   : > { %v270_v39 = vpop.xlane.xlu1 %269 }
 0x18f   : > { %894 = vrsqrt.f32 %v273_v38  ;;  %v272_v40 = vmul.f32 0.0078125, %v270_v39 }
 0x191   : > { %v274_v41 = vadd.f32 1e-05, %v272_v40 }
 0x193   : > { %896 = vrsqrt.f32 %v274_v41 }
 0x199   : > { %v895_v42 = vpop.eup %894 }
 0x19a   : > { %v277_v43 = vmul.f32 %v895_v42, %v1281_v9 }
 0x19c   : > { %v285_v47 = vmul.f32 %v693_v44, %v277_v43 }
 0x19d   : > { %v897_v45 = vpop.eup %896 }
 0x19e   : > { %v278_v46 = vmul.f32 %v897_v45, %v1285_v13  ;;  %v293_v50 = vadd.f32 %v694_v48, %v285_v47 }
 0x1a0   : > { %v286_v49 = vmul.f32 %v693_v44, %v278_v46 }
 0x1a2   : > { %v294_v51 = vadd.f32 %v694_v48, %v286_v49 }
 0x1a4   : > { %v295_v52 = vpack.c.bf16 %v294_v51, %v293_v50 }
 0x1a6   : > { %489 = vmatmul.mubr.bf16.vlgmr.msra.gmra.mrb[0].mxu0 %v295_v52  ;;  %758 = vmatmul.mubr.bf16.vlgmr.msra.gmra.mrb[0].mxu1 %v295_v52 }
 0x279   : > { %v490_v53 = vpop.f32.mrb[0].mxu0  ;;  %v533_v54 = vpop.f32.mrb[0].mxu1 }
 0x27a   : > { %v729_v55 = vpack.c.bf16 %v533_v54, %v533_v54  ;;  %v492_v56 = vpop.f32.mrb[1].mxu0  ;;  %v759_v57 = vpop.f32.mrb[1].mxu1 }
 0x27b   : > { %v728_v58 = vpack.c.bf16 %v492_v56, %v490_v53  ;;  %v494_v59 = vpop.f32.mrb[2].mxu0  ;;  %v536_v60 = vpop.f32.mrb[2].mxu1 }
 0x27c   : > { %561 = vst [vmem:[%s248_s13 + $0x8] sm:$0xf] %v729_v55  ;;  %v731_v61 = vpack.c.bf16 %v536_v60, %v536_v60  ;;  %v496_v62 = vpop.f32.mrb[3].mxu0  ;;  %v760_v63 = vpop.f32.mrb[3].mxu1 }
 0x27d   : > { %560 = vst [vmem:[%s248_s13] sm:$0xff] %v728_v58  ;;  %v730_v0 = vpack.c.bf16 %v496_v62, %v494_v59 }
 0x27e   : > { %563 = vst [vmem:[%s248_s13 + $0x14] sm:$0xf] %v731_v61 }
 0x27f   : > { %562 = vst [vmem:[%s248_s13 + $0xc] sm:$0xff] %v730_v0 }
 0x280   : > { %969 = shalt.err (!%p966_p7)
}
 0x281   : > { %s970_s9 = scalar_lea.hbm %s1312_s23, 384  ;;  %s974_s27 = scalar_lea.hbm %s1370_s4, 1536 }
 0x282   : > { %p971_p1 = scmp.ne.s32.totalorder %s1312_s23, %s970_s9  ;;  %p975_p5 = scmp.lt.u32.totalorder %s1312_s23, %s1370_s4 }
 0x283   : > { %p976_p9 = scmp.lt.u32.totalorder %s974_s27, %s970_s9  ;;  %p978_p0 = scmp.lt.u32.totalorder %s970_s9, %s1312_s23 }
 0x284   : > { %p972_p2 = pnand %p971_p1, %p1202_p11 }
 0x285   : > { %p977_p6 = por %p976_p9, %p975_p5 }
 0x286   : > { %p973_p4 = pneg %p972_p2 }
 0x287   : > { %p979_p8 = por %p978_p0, %p977_p6 }
 0x289   : > { %p980_p10 = pnand %p979_p8, %p973_p4 }
 0x28b   : > { %983 = shalt.err (!%p980_p10)
}
 0x28c   : > { %s1070_s11 = smov 192   ;;  %s1071_s10 = smov 12  }
 0x28d   : > { %770 = dma.vmem_to_hbm [thread:$0]  (%p1202_p11), %s1307_s12, 384, %s1312_s23, %s565_s24, %s1070_s11, %s1070_s11, %s1071_s10  }
 0x28e PF: > { %s1400_s28 = sld [smem:[#allocation11_spill]]  ;;  %s1401_s13 = sld [smem:[#allocation13_spill]] }
 0x28f   : > { %p787_p12 = scmp.ge.s32.totalorder %s1058_s22, 2 }
 0x294   : > { %s596_s14 = sand.u32 1, %s1400_s28   ;;  %p1402_p13 = scmp.ne.s32.totalorder %s1401_s13, 0 }
 0x295   : > { %s597_s18 = scalar_lea.sflag [#allocation4], %s596_s14 }
 0x296   : > { %p781_p3 = pnand %p787_p12, %p1402_p13 }
 0x298   : > { %1025 = dma.done.wait (!%p781_p3), %s597_s18, 384  }
 0x299   : > { %1027 = vsyncadd (!%p781_p3), %s597_s18, 4294966912  ;;  %s21_s22 = sadd.s32 1, %s1058_s22   ;;  %s1403_s18 = sld [smem:[#allocation12_spill]] }
 0x29a   : > { %p18_p7 = scmp.ge.s32.totalorder %s21_s22, 6   ;;  %s1404_s20 = sld [smem:[#allocation14_spill]] }
 0x29b   : > { %s1405_s6 = sld [smem:[#allocation15_spill]]  ;;  %s1406_s15 = smov %s1034_s16 }
 0x29c   : > { %s1407_s16 = smov %s1038_s17  ;;  %s1408_s17 = smov %s1219_s3 }
 0x29d   : > { %s1409_s19 = smov %s1054_s21  ;;  %20 = sbr.rel (!%p18_p7) target bundleno = 10 (0xa), region = 85 }
 0x2a1   : > { %s1410_s21 = smov %s1405_s6 }
 0x2a4   :  { %602 = vsyncpa [#allocation3], 1 }
 0x2a5   :  { %604 = vsyncpa [#allocation3 + $0x1], 1 }
 0x2a6   :  { %605 = vsyncpa [#allocation6], 1 }
 0x2a7   :  { %606 = vsyncpa [#allocation4], 1 }
 0x2a8   :  { %608 = vsyncpa [#allocation4 + $0x1], 1 }

</bundles_post_ra>
